<compile_context>
chip_gen: v5e
topology: v5e:2x2
jax: 0.10.0
libtpu: 0.0.40
codegen_flags: <defaults>
</compile_context>

<pallas_src>
import jax
import jax.numpy as jnp
from jax.experimental import pallas as pl
from jax.experimental.pallas import tpu as pltpu

NUM_STAGES = 2       # operation_count in SubPolicy.__init__
NUM_OPS = 4          # len(operations) in SubPolicyStage.__init__
TEMPERATURE = 0.05

_TARGET_BLOCK_BYTES = 8 * 1024 * 1024    # per-block tile size target (8 MiB)
_VMEM_LIMIT_BYTES = 40 * 1024 * 1024     # in+out double-buffered 8 MiB blocks ~= 32 MiB


def _apply_ops(x):
    """The K elementwise augmentation operations (reference form)."""
    return [
        x,                                          # 0: identity
        1.0 - x,                                    # 1: invert
        jnp.where(x < 0.5, x, 1.0 - x),             # 2: solarize (threshold 0.5)
        jnp.clip(x + 0.1, 0.0, 1.0),                # 3: brightness (+0.1, clamped)
    ]


def subpolicy_kernel(coef_ref, x_ref, o_ref):
    # coef_ref: (NUM_STAGES, 6) f32 folded per-stage coefficients in SMEM:
    #   [c_lo, c_hi, b_lo, b_hi, w3, w3b] with
    #     c_lo = w0-w1+w2, c_hi = w0-w1-w2, b_lo = w1, b_hi = w1+w2, w3b = 0.1*w3
    #   so the stage update  w0*x + w1*(1-x) + w2*solarize(x) + w3*clip(x+0.1,0,1)
    #   becomes  select(x<0.5, c_lo, c_hi)*x + select(x<0.5, b_lo, b_hi)
    #            + min(max(w3*x + w3b, 0), w3)             (~10 VPU ops/elem/stage)
    # x_ref/o_ref: (block_rows, lanes) lane-dense VMEM tile.
    x = x_ref[...].astype(jnp.float32)
    for s in range(NUM_STAGES):
        c_lo = coef_ref[s, 0]
        c_hi = coef_ref[s, 1]
        b_lo = coef_ref[s, 2]
        b_hi = coef_ref[s, 3]
        w3 = coef_ref[s, 4]
        w3b = coef_ref[s, 5]
        m = x < 0.5
        bri = jnp.minimum(jnp.maximum(w3 * x + w3b, 0.0), w3)   # w3*clip(x+0.1,0,1)
        x = jnp.where(m, c_lo, c_hi) * x + jnp.where(m, b_lo, b_hi) + bri
    o_ref[...] = x.astype(o_ref.dtype)


def subpolicy_forward(x, raw_weights, temperature=TEMPERATURE,
                      max_block_rows=None, donate_input=False):
    """x: (B, C, H, W) float; raw_weights: (NUM_STAGES, NUM_OPS) (the _weights params)."""
    orig_shape = x.shape
    orig_dtype = x.dtype
    total = int(x.size)

    # softmax(_weights / temperature) per stage + folded coefficients (plain JAX glue).
    w = jax.nn.softmax(raw_weights.astype(jnp.float32) / temperature, axis=-1)
    w0, w1, w2, w3 = w[:, 0], w[:, 1], w[:, 2], w[:, 3]
    a01 = w0 - w1                                   # identity+invert fold
    coef = jnp.stack([a01 + w2, a01 - w2, w1, w1 + w2, w3, 0.1 * w3], axis=-1)

    # ---- lane-dense 2D layout, avoiding any pad/slice copy whenever possible ----
    lanes = 128
    for cand in (512, 256, 128):
        if total % cand == 0:
            lanes = cand
            break
    rows = -(-total // lanes)                        # ceil div
    padded_total = rows * lanes
    needs_pad = padded_total != total                # only when x.size % 128 != 0

    itemsize = jnp.dtype(orig_dtype).itemsize
    granule = 16 if itemsize == 2 else 8             # bf16 native (16,128) tile

    target_rows = max(granule, _TARGET_BLOCK_BYTES // (lanes * itemsize))
    if max_block_rows is not None:
        target_rows = min(target_rows, max_block_rows)
    target_rows = max(granule, (target_rows // granule) * granule)

    if rows <= granule:
        block_rows = rows                            # single block == full array (always legal)
    else:
        # >=2 blocks so both v7x TensorCores get work; granule-aligned block.
        half = -(-rows // 2)
        half = -(-half // granule) * granule
        block_rows = min(target_rows, half)

    grid = (pl.cdiv(rows, block_rows),)              # last block may be partial

    xf = x.reshape(-1)
    if needs_pad:
        # TODO(synk): rare tail path (x.size not a multiple of 128) still costs one pad copy.
        xf = jnp.pad(xf, (0, padded_total - total))
    x2d = xf.reshape(rows, lanes)

    cost = pl.CostEstimate(
        flops=10 * NUM_STAGES * padded_total,
        transcendentals=0,
        bytes_accessed=2 * padded_total * itemsize,
    )

    out2d = pl.pallas_call(
        subpolicy_kernel,
        out_shape=jax.ShapeDtypeStruct((rows, lanes), orig_dtype),
        grid=grid,
        in_specs=[
            pl.BlockSpec(memory_space=pltpu.MemorySpace.SMEM),      # folded coefficients
            pl.BlockSpec((block_rows, lanes), lambda i: (i, 0)),    # lane-dense row block
        ],
        out_specs=pl.BlockSpec((block_rows, lanes), lambda i: (i, 0)),
        compiler_params=pltpu.CompilerParams(
            dimension_semantics=("parallel",),
            vmem_limit_bytes=_VMEM_LIMIT_BYTES,
        ),
        cost_estimate=cost,
        # In-place update only valid when no padding copy was made.
        input_output_aliases={1: 0} if (donate_input and not needs_pad) else {},
    )(coef, x2d)

    out = out2d.reshape(-1)
    if needs_pad:
        out = out[:total]
    return out.reshape(orig_shape)


def subpolicy_reference(x, raw_weights, temperature=TEMPERATURE):
    """Pure-JAX reference mirroring the PyTorch training-mode forward."""
    w = jax.nn.softmax(raw_weights.astype(jnp.float32) / temperature, axis=-1)
    out = x.astype(jnp.float32)
    for s in range(NUM_STAGES):
        stacked = jnp.stack(_apply_ops(out))                     # (K, B, C, H, W)
        out = (stacked * w[s].reshape(-1, 1, 1, 1, 1)).sum(0)    # weighted sum over ops
    return out.astype(x.dtype)


if __name__ == "__main__":
    key = jax.random.PRNGKey(0)
    k_x1, k_x2, k_x3, k_w = jax.random.split(key, 4)

    # Deterministic parameter init, exactly as in SubPolicyStage.__init__:
    # each stage has _weights = ones(len(operations)); deepcopy -> one row per stage.
    raw_weights = jnp.ones((NUM_STAGES, NUM_OPS), dtype=jnp.float32)

    # --- main test: small NCHW image batch, f32, single lane-dense block, zero padding ---
    x = jax.random.uniform(k_x1, (2, 4, 16, 16), dtype=jnp.float32)
    out = jax.block_until_ready(subpolicy_forward(x, raw_weights))
    ref = subpolicy_reference(x, raw_weights)
    assert out.shape == x.shape and out.dtype == x.dtype
    assert jnp.allclose(out, ref, atol=1e-5, rtol=1e-5), "f32 mismatch vs JAX reference"

    # --- tiling test with non-uniform weights: force a multi-block grid ---
    raw_w2 = 1.0 + 0.05 * jax.random.normal(k_w, (NUM_STAGES, NUM_OPS), dtype=jnp.float32)
    x2 = jax.random.uniform(k_x2, (2, 4, 32, 32), dtype=jnp.float32)
    out2 = jax.block_until_ready(subpolicy_forward(x2, raw_w2, max_block_rows=8))
    ref2 = subpolicy_reference(x2, raw_w2)
    assert jnp.allclose(out2, ref2, atol=1e-5, rtol=1e-5), "tiled mismatch vs JAX reference"

    # --- partial-last-block test: 3*3*16*16 = 2304 -> (9, 256), 2 blocks of 8 rows ---
    x3 = jax.random.uniform(k_x3, (3, 3, 16, 16), dtype=jnp.float32)
    out3 = jax.block_until_ready(subpolicy_forward(x3, raw_weights))
    ref3 = subpolicy_reference(x3, raw_weights)
    assert jnp.allclose(out3, ref3, atol=1e-5, rtol=1e-5), "partial-block mismatch vs reference"

    # --- bf16 I/O path (halves HBM traffic; compute stays f32 inside the kernel) ---
    xb = x.astype(jnp.bfloat16)
    outb = jax.block_until_ready(subpolicy_forward(xb, raw_weights))
    refb = subpolicy_reference(xb, raw_weights)
    assert outb.dtype == jnp.bfloat16
    assert jnp.allclose(outb.astype(jnp.float32), refb.astype(jnp.float32),
                        atol=2e-2, rtol=2e-2), "bf16 mismatch vs JAX reference"

    print("KERNEL_OK")
</pallas_src>

<mosaic_0001>
module attributes {stable_mosaic.version = 11 : i64} {
  func.func @subpolicy_kernel(%arg0: i32, %arg1: memref<2x6xf32, #tpu.memory_space<smem>>, %arg2: memref<4x512xf32, #tpu.memory_space<vmem>>, %arg3: memref<4x512xf32, #tpu.memory_space<vmem>>) attributes {dimension_semantics = [#tpu.dimension_semantics<parallel>], iteration_bounds = array<i64: 1>, scalar_prefetch = 0 : i64, scratch_operands = 0 : i64, tpu.core_type = #tpu.core_type<tc>, window_params = [{transform_indices = @transform_0, window_bounds = array<i64: 2, 6>}, {transform_indices = @transform_1, window_bounds = array<i64: 4, 512>}, {transform_indices = @transform_2, window_bounds = array<i64: 4, 512>}]} {
    %c0 = arith.constant 0 : index
    %c0_0 = arith.constant 0 : index
    %0 = vector.load %arg2[%c0, %c0_0] : memref<4x512xf32, #tpu.memory_space<vmem>>, vector<4x512xf32>
    %c0_1 = arith.constant 0 : index
    %c0_2 = arith.constant 0 : index
    %1 = memref.load %arg1[%c0_1, %c0_2] : memref<2x6xf32, #tpu.memory_space<smem>>
    %c0_3 = arith.constant 0 : index
    %c1 = arith.constant 1 : index
    %2 = memref.load %arg1[%c0_3, %c1] : memref<2x6xf32, #tpu.memory_space<smem>>
    %c0_4 = arith.constant 0 : index
    %c2 = arith.constant 2 : index
    %3 = memref.load %arg1[%c0_4, %c2] : memref<2x6xf32, #tpu.memory_space<smem>>
    %c0_5 = arith.constant 0 : index
    %c3 = arith.constant 3 : index
    %4 = memref.load %arg1[%c0_5, %c3] : memref<2x6xf32, #tpu.memory_space<smem>>
    %c0_6 = arith.constant 0 : index
    %c4 = arith.constant 4 : index
    %5 = memref.load %arg1[%c0_6, %c4] : memref<2x6xf32, #tpu.memory_space<smem>>
    %c0_7 = arith.constant 0 : index
    %c5 = arith.constant 5 : index
    %6 = memref.load %arg1[%c0_7, %c5] : memref<2x6xf32, #tpu.memory_space<smem>>
    %cst = arith.constant 5.000000e-01 : f32
    %7 = vector.broadcast %cst : f32 to vector<4x512xf32>
    %8 = arith.cmpf olt, %0, %7 : vector<4x512xf32>
    %9 = vector.broadcast %5 : f32 to vector<4x512xf32>
    %10 = arith.mulf %9, %0 : vector<4x512xf32>
    %11 = vector.broadcast %6 : f32 to vector<4x512xf32>
    %12 = arith.addf %10, %11 : vector<4x512xf32>
    %cst_8 = arith.constant 0.000000e+00 : f32
    %13 = vector.broadcast %cst_8 : f32 to vector<4x512xf32>
    %14 = arith.maximumf %12, %13 : vector<4x512xf32>
    %15 = vector.broadcast %5 : f32 to vector<4x512xf32>
    %16 = arith.minimumf %14, %15 : vector<4x512xf32>
    %17 = vector.broadcast %1 : f32 to vector<4x512xf32>
    %18 = vector.broadcast %2 : f32 to vector<4x512xf32>
    %19 = arith.select %8, %17, %18 : vector<4x512xi1>, vector<4x512xf32>
    %20 = arith.mulf %19, %0 : vector<4x512xf32>
    %21 = vector.broadcast %3 : f32 to vector<4x512xf32>
    %22 = vector.broadcast %4 : f32 to vector<4x512xf32>
    %23 = arith.select %8, %21, %22 : vector<4x512xi1>, vector<4x512xf32>
    %24 = arith.addf %20, %23 : vector<4x512xf32>
    %25 = arith.addf %24, %16 : vector<4x512xf32>
    %c1_9 = arith.constant 1 : index
    %c0_10 = arith.constant 0 : index
    %26 = memref.load %arg1[%c1_9, %c0_10] : memref<2x6xf32, #tpu.memory_space<smem>>
    %c1_11 = arith.constant 1 : index
    %c1_12 = arith.constant 1 : index
    %27 = memref.load %arg1[%c1_11, %c1_12] : memref<2x6xf32, #tpu.memory_space<smem>>
    %c1_13 = arith.constant 1 : index
    %c2_14 = arith.constant 2 : index
    %28 = memref.load %arg1[%c1_13, %c2_14] : memref<2x6xf32, #tpu.memory_space<smem>>
    %c1_15 = arith.constant 1 : index
    %c3_16 = arith.constant 3 : index
    %29 = memref.load %arg1[%c1_15, %c3_16] : memref<2x6xf32, #tpu.memory_space<smem>>
    %c1_17 = arith.constant 1 : index
    %c4_18 = arith.constant 4 : index
    %30 = memref.load %arg1[%c1_17, %c4_18] : memref<2x6xf32, #tpu.memory_space<smem>>
    %c1_19 = arith.constant 1 : index
    %c5_20 = arith.constant 5 : index
    %31 = memref.load %arg1[%c1_19, %c5_20] : memref<2x6xf32, #tpu.memory_space<smem>>
    %cst_21 = arith.constant 5.000000e-01 : f32
    %32 = vector.broadcast %cst_21 : f32 to vector<4x512xf32>
    %33 = arith.cmpf olt, %25, %32 : vector<4x512xf32>
    %34 = vector.broadcast %30 : f32 to vector<4x512xf32>
    %35 = arith.mulf %34, %25 : vector<4x512xf32>
    %36 = vector.broadcast %31 : f32 to vector<4x512xf32>
    %37 = arith.addf %35, %36 : vector<4x512xf32>
    %cst_22 = arith.constant 0.000000e+00 : f32
    %38 = vector.broadcast %cst_22 : f32 to vector<4x512xf32>
    %39 = arith.maximumf %37, %38 : vector<4x512xf32>
    %40 = vector.broadcast %30 : f32 to vector<4x512xf32>
    %41 = arith.minimumf %39, %40 : vector<4x512xf32>
    %42 = vector.broadcast %26 : f32 to vector<4x512xf32>
    %43 = vector.broadcast %27 : f32 to vector<4x512xf32>
    %44 = arith.select %33, %42, %43 : vector<4x512xi1>, vector<4x512xf32>
    %45 = arith.mulf %44, %25 : vector<4x512xf32>
    %46 = vector.broadcast %28 : f32 to vector<4x512xf32>
    %47 = vector.broadcast %29 : f32 to vector<4x512xf32>
    %48 = arith.select %33, %46, %47 : vector<4x512xi1>, vector<4x512xf32>
    %49 = arith.addf %45, %48 : vector<4x512xf32>
    %50 = arith.addf %49, %41 : vector<4x512xf32>
    %c0_23 = arith.constant 0 : index
    %c0_24 = arith.constant 0 : index
    %51 = vector.load %arg3[%c0_23, %c0_24] : memref<4x512xf32, #tpu.memory_space<vmem>>, vector<4x512xf32>
    tpu.vector_store %arg3[%c0_23, %c0_24], %50 {strides = array<i32>} : memref<4x512xf32, #tpu.memory_space<vmem>>, vector<4x512xf32>,
    return
  }
  func.func @transform_0(%arg0: i32) -> (i32, i32) {
    %c0_i32 = arith.constant 0 : i32
    %c0_i32_0 = arith.constant 0 : i32
    %c0_i32_1 = arith.constant 0 : i32
    return %c0_i32, %c0_i32_0 : i32, i32
  }
  func.func @transform_1(%arg0: i32) -> (i32, i32) {
    %c0_i32 = arith.constant 0 : i32
    %c0_i32_0 = arith.constant 0 : i32
    return %arg0, %c0_i32 : i32, i32
  }
  func.func @transform_2(%arg0: i32) -> (i32, i32) {
    %c0_i32 = arith.constant 0 : i32
    %c0_i32_0 = arith.constant 0 : i32
    return %arg0, %c0_i32 : i32, i32
  }
}

</mosaic_0001>

<bundles_post_ra>
// kernel: tpu_custom_call.1
= control target key start
LH: loop header
LB: loop body
LE: loop exit
PB: predicated region body
PF: predicated region fallthrough
CT: control target
= control target key end

     0   :  { %7 = vsyncpa [#allocation5], 0  ;;  %s245_s0 = inlined_call_operand.hbm [shape: f32[2,6], index: 0, kind: input, shape index: {}]   ;;  %s246_s1 = inlined_call_operand.hbm [shape: f32[4,512], index: 1, kind: input, shape index: {}]   ;;  %s247_s2 = inlined_call_operand.hbm [shape: f32[4,512], index: 2, kind: output, shape index: {}]  }
   0x1   :  { %8 = vsyncpa [#allocation3], 0 }
   0x2   :  { %9 = vsyncpa [#allocation4], 0  ;;  %s15_s11 = sshll.u32 %s245_s0, 4  ;;  %s24_s14 = sshll.u32 %s246_s1, 4  ;;  %s16_s11 = int_to_ptr.hbm [resolvable:$true] %s15_s11  ;;  %s25_s14 = int_to_ptr.hbm [resolvable:$true] %s24_s14 }
   0x3   :  { %s205_s15 = smov [#allocation2]   ;;  %s206_s16 = smov [#allocation6]  }
   0x4   :  { %18 = dma.hbm_to_smem %s16_s11, 32, %s205_s15, [#allocation5]  }
   0x5   :  { %s26_s17 = sshll.u32 %s206_s16, 4  ;;  %s27_s17 = int_to_ptr.vmem [resolvable:$true] %s26_s17 }
   0x6   :  { %29 = dma.hbm_to_vmem [thread:$0]  %s25_s14, 256, %s27_s17, [#allocation3]  }
   0x7   :  { %199 = dma.done.wait [#allocation5], 32  }
   0x8   :  { %200 = vsyncadd [#allocation5], 4294967264 }
   0x9   :  { %201 = dma.done.wait [#allocation3], 256  }
   0xa   :  { %202 = vsyncadd [#allocation3], 4294967040 }
   0xb   :  { %38 = sfence }
   0xc   :  { %s41_s18 = sld [smem:[#allocation2]]  ;;  %v39_v0 = vld [vmem:[#allocation6] sm:$0xff]  ;;  %v40_v1 = vld [vmem:[#allocation6 + $0x8] sm:$0xff]  ;;  %s207_s28 = smov [#allocation7]  }
   0xd   :  { %s125_s19 = sld [smem:[#allocation2 + $0x1]]  ;;  %vm47_vm0 = vcmp.lt.f32.partialorder %v39_v0, 0.5  ;;  %vm48_vm1 = vcmp.lt.f32.partialorder %v40_v1, 0.5  ;;  %s112_s29 = sshll.u32 %s207_s28, 4  ;;  %s113_s29 = int_to_ptr.vmem [resolvable:$true] %s112_s29 }
   0xe   :  { %s126_s0 = sld [smem:[#allocation2 + $0x2]]  ;;  %s114_s4 = sshll.u32 %s247_s2, 4  ;;  %s115_s4 = int_to_ptr.hbm [resolvable:$true] %s114_s4 }
   0xf   :  { %s127_s20 = sld [smem:[#allocation2 + $0x3]] }
  0x10   :  { %s128_s21 = sld [smem:[#allocation2 + $0x4]] }
  0x11   :  { %s129_s1 = sld [smem:[#allocation2 + $0x5]] }
  0x12   :  { %v59_v2 = vstv %s41_s18  ;;  %s229_s22 = sld [smem:[#allocation2 + $0x80]] }
  0x13   :  { %v60_v3 = vstv %s125_s19  ;;  %s232_s23 = sld [smem:[#allocation2 + $0x81]] }
  0x14   :  { %v61_v4 = vsel %vm47_vm0, %v59_v2, %v60_v3  ;;  %v62_v5 = vsel %vm48_vm1, %v59_v2, %v60_v3  ;;  %v65_v6 = vstv %s126_s0  ;;  %s235_s24 = sld [smem:[#allocation2 + $0x82]] }
  0x15   :  { %v66_v7 = vstv %s127_s20  ;;  %v63_v9 = vmul.f32 %v61_v4, %v39_v0  ;;  %s134_s25 = sld [smem:[#allocation2 + $0x84]]  ;;  %v64_v13 = vmul.f32 %v62_v5, %v40_v1 }
  0x16   :  { %v49_v8 = vstv %s128_s21  ;;  %s133_s26 = sld [smem:[#allocation2 + $0x83]]  ;;  %v67_v14 = vsel %vm47_vm0, %v65_v6, %v66_v7  ;;  %v68_v15 = vsel %vm48_vm1, %v65_v6, %v66_v7 }
  0x17   :  { %v50_v10 = vmul.f32 %v49_v8, %v39_v0  ;;  %v52_v11 = vstv %s129_s1  ;;  %v51_v12 = vmul.f32 %v49_v8, %v40_v1  ;;  %s135_s27 = sld [smem:[#allocation2 + $0x85]]  ;;  %v69_v19 = vadd.f32 %v67_v14, %v63_v9 }
  0x18   :  { %v70_v21 = vadd.f32 %v68_v15, %v64_v13  ;;  %v91_v25 = vstv %s229_s22 }
  0x19   :  { %v53_v16 = vadd.f32 %v52_v11, %v50_v10  ;;  %v54_v17 = vadd.f32 %v52_v11, %v51_v12  ;;  %v92_v26 = vstv %s232_s23 }
  0x1a   :  { %v97_v28 = vstv %s235_s24 }
  0x1b   :  { %v55_v18 = vmax.f32 %v53_v16, 0.0  ;;  %v56_v20 = vmax.f32 %v54_v17, 0.0  ;;  %v81_v24 = vstv %s134_s25 }
  0x1c   :  { %v98_v29 = vstv %s133_s26 }
  0x1d   :  { %v57_v22 = vmin.f32 %v55_v18, %v49_v8  ;;  %v58_v23 = vmin.f32 %v56_v20, %v49_v8  ;;  %v84_v31 = vstv %s135_s27 }
  0x1f   :  { %v71_v27 = vadd.f32 %v69_v19, %v57_v22  ;;  %v72_v30 = vadd.f32 %v70_v21, %v58_v23 }
  0x21   :  { %vm79_vm2 = vcmp.lt.f32.partialorder %v71_v27, 0.5  ;;  %v82_v32 = vmul.f32 %v81_v24, %v71_v27  ;;  %vm80_vm3 = vcmp.lt.f32.partialorder %v72_v30, 0.5  ;;  %v83_v33 = vmul.f32 %v81_v24, %v72_v30 }
  0x22   :  { %v93_v34 = vsel %vm79_vm2, %v91_v25, %v92_v26  ;;  %v99_v35 = vsel %vm79_vm2, %v97_v28, %v98_v29  ;;  %v94_v36 = vsel %vm80_vm3, %v91_v25, %v92_v26  ;;  %v100_v37 = vsel %vm80_vm3, %v97_v28, %v98_v29 }
  0x23   :  { %v85_v38 = vadd.f32 %v84_v31, %v82_v32  ;;  %v95_v39 = vmul.f32 %v93_v34, %v71_v27  ;;  %v86_v40 = vadd.f32 %v84_v31, %v83_v33  ;;  %v96_v41 = vmul.f32 %v94_v36, %v72_v30 }
  0x25   :  { %v87_v42 = vmax.f32 %v85_v38, 0.0  ;;  %v101_v43 = vadd.f32 %v99_v35, %v95_v39  ;;  %v88_v44 = vmax.f32 %v86_v40, 0.0  ;;  %v102_v45 = vadd.f32 %v100_v37, %v96_v41 }
  0x27   :  { %v89_v46 = vmin.f32 %v87_v42, %v81_v24  ;;  %v90_v47 = vmin.f32 %v88_v44, %v81_v24 }
  0x29   :  { %v103_v48 = vadd.f32 %v101_v43, %v89_v46  ;;  %v104_v49 = vadd.f32 %v102_v45, %v90_v47 }
  0x2b   :  { %105 = vst [vmem:[#allocation7] sm:$0xff] %v103_v48 }
  0x2c   :  { %106 = vst [vmem:[#allocation7 + $0x8] sm:$0xff] %v104_v49 }
  0x2d   :  { %117 = dma.vmem_to_hbm [thread:$0]  %s113_s29, 256, %s115_s4, [#allocation4]  }
  0x2e   :  { %203 = dma.done.wait [#allocation4], 256  }
  0x2f   :  { %204 = vsyncadd [#allocation4], 4294967040 }
  0x30   :  { %122 = vsyncpa [#allocation3], 1 }
  0x31   :  { %123 = vsyncpa [#allocation4], 1 }
  0x32   :  { %124 = vsyncpa [#allocation5], 1 }

</bundles_post_ra>
